<compile_context>
chip_gen: v7x
topology: tpu7x:2x2x1
jax: 0.10.0
libtpu: 0.0.40
codegen_flags: <defaults>
</compile_context>

<pallas_src>
import functools

import jax
import jax.numpy as jnp
from jax.experimental import pallas as pl
from jax.experimental.pallas import tpu as pltpu

KERNEL_SIZE = 3  # must be 3 or 7 (padding = ks // 2)


def _divisors(n):
    return [d for d in range(1, n + 1) if n % d == 0]


def _tpu_num_tensorcores_and_budget():
    """(num TensorCores per chip, per-tile byte budget) from the device kind."""
    try:
        kind = jax.devices()[0].device_kind.lower()
    except Exception:  # pragma: no cover - CPU/interpret fallback
        kind = ""
    if "v7" in kind:
        # v7x: 2 TCs, only 64 MiB VMEM -> smaller tiles, keep >=2 parallel steps.
        return 2, 4 << 20
    # v5e / v6e: 1 TC, 128 MiB VMEM -> bigger tiles, no parallel-step cap.
    return 1, 8 << 20


def _pick_blocks(N, C, HW, itemsize, *, budget_bytes, num_tc):
    """Pick (n_blk, c_blk): n_blk prefers sublane-full multiples of 8, c_blk is
    dtype-aligned; c_blk is traded for n_blk inside the same byte budget."""
    # dtype-aware channel alignment (rows packed per sublane: 8 f32 / 16 bf16 / 32 i8)
    align = 8 * max(1, 4 // itemsize)
    c_cands = [d for d in _divisors(C) if d % align == 0]
    if not c_cands and align > 8:
        c_cands = [d for d in _divisors(C) if d % 8 == 0]
    if not c_cands:
        c_cands = [C]          # whole-C fallback (rare for CBAM channel counts)
    if C not in c_cands:
        c_cands.append(C)
    c_cands = sorted(set(c_cands))
    c_min = c_cands[0]

    # Batch block: keep >=2 "parallel" steps only on 2-TC chips (v7x megacore);
    # otherwise use the full budget for sublane density / fewer grid steps.
    n_cap = N if (num_tc < 2 or N <= 1) else max(1, N // 2)
    n_cands = [d for d in _divisors(N) if d <= n_cap]

    def n_score(nb):
        return (nb % 8 == 0, nb)   # prefer sublane-full (multiple of 8), then largest

    n_blk = 1
    for nb in n_cands:
        if nb * c_min * HW * itemsize <= budget_bytes and n_score(nb) >= n_score(n_blk):
            n_blk = nb

    c_blk = c_min
    for c in c_cands:
        if n_blk * c * HW * itemsize <= budget_bytes:
            c_blk = max(c_blk, c)
    return n_blk, c_blk


def _spatial_attention_kernel(w_ref, mask_ref, x_ref, o_ref, sum_ref, max_ref,
                              *, H, W, ks, lpad):
    # w_ref    : SMEM (2*ks*ks,) f32  -- [avg taps (with 1/C folded in) | max taps]
    # mask_ref : VMEM (ks, H*W) f32   -- {0,1} column-wrap masks, row (dj + p)
    # x_ref    : VMEM (nb, c_blk, H*W) input block (lane-dense over H*W)
    # o_ref    : VMEM (nb, 1, H*W) output block
    # sum/max_ref: VMEM (nb, H*W + lpad + S) f32 padded flat accumulators
    p = ks // 2
    S = p * W + p
    HW = H * W
    c_idx = pl.program_id(1)
    last_c = pl.num_programs(1) - 1
    nb = sum_ref.shape[0]

    xb = x_ref[...]                                      # (nb, c_blk, HW)
    blk_sum = jnp.sum(xb.astype(jnp.float32), axis=1)    # fused single pass over C:
    blk_max = jnp.max(xb, axis=1).astype(jnp.float32)    #   f32 sum + native max

    @pl.when(c_idx == 0)
    def _init():
        # Zero only the pad regions (they stay 0, matching the conv's zero
        # padding of the reduced maps); the live region gets the first maps.
        zpad_l = jnp.zeros((nb, lpad), jnp.float32)
        zpad_r = jnp.zeros((nb, S), jnp.float32)
        sum_ref[:, :lpad] = zpad_l
        sum_ref[:, lpad + HW:] = zpad_r
        max_ref[:, :lpad] = zpad_l
        max_ref[:, lpad + HW:] = zpad_r
        sum_ref[:, lpad:lpad + HW] = blk_sum
        max_ref[:, lpad:lpad + HW] = blk_max

    @pl.when(c_idx > 0)
    def _accumulate():
        sum_ref[:, lpad:lpad + HW] = sum_ref[:, lpad:lpad + HW] + blk_sum
        max_ref[:, lpad:lpad + HW] = jnp.maximum(max_ref[:, lpad:lpad + HW], blk_max)

    @pl.when(c_idx == last_c)
    def _finalize():
        acc = jnp.zeros((nb, HW), jnp.float32)
        # ks x ks conv on the flattened zero-padded maps: tap (di, dj) is a
        # static slice at flat offset di*W + dj; only column wrap-around across
        # row boundaries needs masking (row out-of-range reads the zero pad).
        for dj in range(-p, p + 1):
            acc_j = jnp.zeros((nb, HW), jnp.float32)
            for di in range(-p, p + 1):
                off = lpad + di * W + dj
                w_avg = w_ref[(di + p) * ks + (dj + p)]          # 1/C folded in
                w_max = w_ref[ks * ks + (di + p) * ks + (dj + p)]
                acc_j = acc_j + w_avg * sum_ref[:, off:off + HW]
                acc_j = acc_j + w_max * max_ref[:, off:off + HW]
            if dj != 0:
                acc_j = acc_j * mask_ref[dj + p:dj + p + 1, :]   # one vmul per dj
            acc = acc + acc_j
        o_ref[:, 0, :] = jax.nn.sigmoid(acc).astype(o_ref.dtype)


@functools.partial(jax.jit, static_argnames=("kernel_size",))
def spatial_attention(x, conv_weight, *, kernel_size=KERNEL_SIZE):
    """x: (N, C, H, W); conv_weight: (1, 2, ks, ks) -> (N, 1, H, W) attention map."""
    assert kernel_size in (3, 7), "kernel size must be 3 or 7"
    N, C, H, W = x.shape
    ks = kernel_size
    assert conv_weight.shape == (1, 2, ks, ks)
    p = ks // 2
    HW = H * W
    itemsize = jnp.dtype(x.dtype).itemsize

    # Free reshape of contiguous NCHW: the channel reduction is lane-dense.
    x3 = x.reshape(N, C, HW)

    # Fold 1/C of the channel mean into the avg-channel weights; flatten for
    # SMEM scalar access: [avg taps | max taps].
    w = conv_weight.astype(jnp.float32)
    w_flat = jnp.concatenate([w[0, 0].reshape(-1) / C, w[0, 1].reshape(-1)])

    # {0,1} column-wrap masks, one row per dj (row dj + p); dj = 0 is all ones.
    col = jnp.arange(HW, dtype=jnp.int32) % W
    mask_rows = []
    for dj in range(-p, p + 1):
        if dj > 0:
            m = (col < W - dj)
        elif dj < 0:
            m = (col >= -dj)
        else:
            m = jnp.ones((HW,), bool)
        mask_rows.append(m.astype(jnp.float32))
    masks = jnp.stack(mask_rows)  # (ks, HW)

    # Flat zero-pad around the reduced maps: S covers any tap offset |di*W+dj|.
    # The left pad is rounded up to a lane multiple so the per-C-step
    # accumulator update is a 128-aligned full-width load/store.
    S = p * W + p
    lpad = -(-S // 128) * 128

    num_tc, budget = _tpu_num_tensorcores_and_budget()
    n_blk, c_blk = _pick_blocks(N, C, HW, itemsize,
                                budget_bytes=budget, num_tc=num_tc)
    grid = (N // n_blk, C // c_blk)

    # Explicit VMEM limit: double-buffered x/out tiles + accumulators + margin.
    x_tile_bytes = n_blk * c_blk * HW * itemsize
    out_tile_bytes = n_blk * HW * itemsize
    acc_bytes = 2 * n_blk * (HW + lpad + S) * 4
    misc_bytes = ks * HW * 4 + 4096
    needed = 2 * (x_tile_bytes + out_tile_bytes + misc_bytes) + acc_bytes
    vmem_limit = int(min(48 << 20, max(32 << 20, needed + (8 << 20))))

    kernel = functools.partial(_spatial_attention_kernel,
                               H=H, W=W, ks=ks, lpad=lpad)

    out = pl.pallas_call(
        kernel,
        out_shape=jax.ShapeDtypeStruct((N, 1, HW), x.dtype),
        grid=grid,
        in_specs=[
            pl.BlockSpec(memory_space=pltpu.MemorySpace.SMEM),         # conv weights
            pl.BlockSpec((ks, HW), lambda n, c: (0, 0)),               # wrap masks
            pl.BlockSpec((n_blk, c_blk, HW), lambda n, c: (n, c, 0)),  # x tile
        ],
        out_specs=pl.BlockSpec((n_blk, 1, HW), lambda n, c: (n, 0, 0)),
        scratch_shapes=[
            pltpu.VMEM((n_blk, HW + lpad + S), jnp.float32),  # running sum (padded)
            pltpu.VMEM((n_blk, HW + lpad + S), jnp.float32),  # running max (padded)
        ],
        compiler_params=pltpu.CompilerParams(
            dimension_semantics=("parallel", "arbitrary"),
            vmem_limit_bytes=vmem_limit),
    )(w_flat, masks, x3)

    return out.reshape(N, 1, H, W)


def _reference(x, conv_weight, *, kernel_size=KERNEL_SIZE):
    """Pure-JAX reference mirroring the PyTorch forward."""
    pad = kernel_size // 2
    avg = jnp.mean(x, axis=1, keepdims=True)
    mx = jnp.max(x, axis=1, keepdims=True)
    feat = jnp.concatenate([avg, mx], axis=1)  # (N, 2, H, W)
    y = jax.lax.conv_general_dilated(
        feat, conv_weight,
        window_strides=(1, 1),
        padding=((pad, pad), (pad, pad)),
        dimension_numbers=("NCHW", "OIHW", "NCHW"))
    return jax.nn.sigmoid(y)


if __name__ == "__main__":
    key = jax.random.PRNGKey(0)
    kx, kw = jax.random.split(key)

    N, C, H, W = 2, 4, 16, 16
    x = jax.random.normal(kx, (N, C, H, W), dtype=jnp.float32)

    # Deterministic parameter init (shape from nn.Conv2d(2, 1, 3, bias=False)).
    conv_weight = (jax.random.normal(kw, (1, 2, KERNEL_SIZE, KERNEL_SIZE),
                                     dtype=jnp.float32) * 0.1)

    out = spatial_attention(x, conv_weight)
    out = jax.block_until_ready(out)

    ref = _reference(x, conv_weight)
    assert out.shape == (N, 1, H, W), out.shape
    assert jnp.allclose(out, ref, atol=1e-5, rtol=1e-5), (
        float(jnp.max(jnp.abs(out - ref))))

    print("KERNEL_OK")
</pallas_src>

<mosaic_0001>
module attributes {stable_mosaic.version = 11 : i64} {
  func.func @_spatial_attention_kernel(%arg0: i32, %arg1: i32, %arg2: memref<18xf32, #tpu.memory_space<smem>>, %arg3: memref<3x256xf32, #tpu.memory_space<vmem>>, %arg4: memref<2x4x256xf32, #tpu.memory_space<vmem>>, %arg5: memref<2x1x256xf32, #tpu.memory_space<vmem>>, %arg6: memref<2x401xf32, #tpu.memory_space<vmem>>, %arg7: memref<2x401xf32, #tpu.memory_space<vmem>>) attributes {dimension_semantics = [#tpu.dimension_semantics<parallel>, #tpu.dimension_semantics<arbitrary>], iteration_bounds = array<i64: 1, 1>, scalar_prefetch = 0 : i64, scratch_operands = 2 : i64, tpu.core_type = #tpu.core_type<tc>, window_params = [{transform_indices = @transform_0, window_bounds = array<i64: 18>}, {pipeline_mode = #tpu.pipeline_mode<synchronous>, transform_indices = @transform_1, window_bounds = array<i64: 3, 256>}, {transform_indices = @transform_2, window_bounds = array<i64: 2, 4, 256>}, {transform_indices = @transform_3, window_bounds = array<i64: 2, 1, 256>}]} {
    %c0 = arith.constant 0 : index
    %c0_0 = arith.constant 0 : index
    %c0_1 = arith.constant 0 : index
    %0 = vector.load %arg4[%c0, %c0_0, %c0_1] : memref<2x4x256xf32, #tpu.memory_space<vmem>>, vector<2x4x256xf32>
    %cst = arith.constant dense<0.000000e+00> : vector<2x256xf32>
    %1 = vector.multi_reduction <add>, %0, %cst [1] : vector<2x4x256xf32> to vector<2x256xf32>
    %cst_2 = arith.constant dense<0xFF800000> : vector<2x256xf32>
    %2 = vector.multi_reduction <maximumf>, %0, %cst_2 [1] : vector<2x4x256xf32> to vector<2x256xf32>
    %c0_i32 = arith.constant 0 : i32
    %3 = arith.cmpi eq, %arg1, %c0_i32 : i32
    %4 = arith.extui %3 : i1 to i32
    %c0_i32_3 = arith.constant 0 : i32
    %5 = arith.cmpi ne, %4, %c0_i32_3 : i32
    scf.if %5 {
      %cst_8 = arith.constant 0.000000e+00 : f32
      %12 = vector.broadcast %cst_8 : f32 to vector<2x128xf32>
      %cst_9 = arith.constant 0.000000e+00 : f32
      %13 = vector.broadcast %cst_9 : f32 to vector<2x17xf32>
      %c0_10 = arith.constant 0 : index
      %c0_11 = arith.constant 0 : index
      %14 = vector.load %arg6[%c0_10, %c0_11] : memref<2x401xf32, #tpu.memory_space<vmem>>, vector<2x128xf32>
      tpu.vector_store %arg6[%c0_10, %c0_11], %12 {strides = array<i32>} : memref<2x401xf32, #tpu.memory_space<vmem>>, vector<2x128xf32>,
      %c0_12 = arith.constant 0 : index
      %c384 = arith.constant 384 : index
      %15 = vector.load %arg6[%c0_12, %c384] : memref<2x401xf32, #tpu.memory_space<vmem>>, vector<2x17xf32>
      tpu.vector_store %arg6[%c0_12, %c384], %13 {strides = array<i32>} : memref<2x401xf32, #tpu.memory_space<vmem>>, vector<2x17xf32>,
      %c0_13 = arith.constant 0 : index
      %c0_14 = arith.constant 0 : index
      %16 = vector.load %arg7[%c0_13, %c0_14] : memref<2x401xf32, #tpu.memory_space<vmem>>, vector<2x128xf32>
      tpu.vector_store %arg7[%c0_13, %c0_14], %12 {strides = array<i32>} : memref<2x401xf32, #tpu.memory_space<vmem>>, vector<2x128xf32>,
      %c0_15 = arith.constant 0 : index
      %c384_16 = arith.constant 384 : index
      %17 = vector.load %arg7[%c0_15, %c384_16] : memref<2x401xf32, #tpu.memory_space<vmem>>, vector<2x17xf32>
      tpu.vector_store %arg7[%c0_15, %c384_16], %13 {strides = array<i32>} : memref<2x401xf32, #tpu.memory_space<vmem>>, vector<2x17xf32>,
      %c0_17 = arith.constant 0 : index
      %c128 = arith.constant 128 : index
      %18 = vector.load %arg6[%c0_17, %c128] : memref<2x401xf32, #tpu.memory_space<vmem>>, vector<2x256xf32>
      tpu.vector_store %arg6[%c0_17, %c128], %1 {strides = array<i32>} : memref<2x401xf32, #tpu.memory_space<vmem>>, vector<2x256xf32>,
      %c0_18 = arith.constant 0 : index
      %c128_19 = arith.constant 128 : index
      %19 = vector.load %arg7[%c0_18, %c128_19] : memref<2x401xf32, #tpu.memory_space<vmem>>, vector<2x256xf32>
      tpu.vector_store %arg7[%c0_18, %c128_19], %2 {strides = array<i32>} : memref<2x401xf32, #tpu.memory_space<vmem>>, vector<2x256xf32>,
    } else {
    }
    %c0_i32_4 = arith.constant 0 : i32
    %6 = arith.cmpi sgt, %arg1, %c0_i32_4 : i32
    %7 = arith.extui %6 : i1 to i32
    %c0_i32_5 = arith.constant 0 : i32
    %8 = arith.cmpi ne, %7, %c0_i32_5 : i32
    scf.if %8 {
      %c0_8 = arith.constant 0 : index
      %c128 = arith.constant 128 : index
      %12 = vector.load %arg6[%c0_8, %c128] : memref<2x401xf32, #tpu.memory_space<vmem>>, vector<2x256xf32>
      %13 = arith.addf %12, %1 : vector<2x256xf32>
      %c0_9 = arith.constant 0 : index
      %c128_10 = arith.constant 128 : index
      %14 = vector.load %arg6[%c0_9, %c128_10] : memref<2x401xf32, #tpu.memory_space<vmem>>, vector<2x256xf32>
      tpu.vector_store %arg6[%c0_9, %c128_10], %13 {strides = array<i32>} : memref<2x401xf32, #tpu.memory_space<vmem>>, vector<2x256xf32>,
      %c0_11 = arith.constant 0 : index
      %c128_12 = arith.constant 128 : index
      %15 = vector.load %arg7[%c0_11, %c128_12] : memref<2x401xf32, #tpu.memory_space<vmem>>, vector<2x256xf32>
      %16 = arith.maximumf %15, %2 : vector<2x256xf32>
      %c0_13 = arith.constant 0 : index
      %c128_14 = arith.constant 128 : index
      %17 = vector.load %arg7[%c0_13, %c128_14] : memref<2x401xf32, #tpu.memory_space<vmem>>, vector<2x256xf32>
      tpu.vector_store %arg7[%c0_13, %c128_14], %16 {strides = array<i32>} : memref<2x401xf32, #tpu.memory_space<vmem>>, vector<2x256xf32>,
    } else {
    }
    %c0_i32_6 = arith.constant 0 : i32
    %9 = arith.cmpi eq, %arg1, %c0_i32_6 : i32
    %10 = arith.extui %9 : i1 to i32
    %c0_i32_7 = arith.constant 0 : i32
    %11 = arith.cmpi ne, %10, %c0_i32_7 : i32
    scf.if %11 {
      %cst_8 = arith.constant 0.000000e+00 : f32
      %12 = vector.broadcast %cst_8 : f32 to vector<2x256xf32>
      %cst_9 = arith.constant 0.000000e+00 : f32
      %13 = vector.broadcast %cst_9 : f32 to vector<2x256xf32>
      %c0_10 = arith.constant 0 : index
      %14 = memref.load %arg2[%c0_10] : memref<18xf32, #tpu.memory_space<smem>>
      %c9 = arith.constant 9 : index
      %15 = memref.load %arg2[%c9] : memref<18xf32, #tpu.memory_space<smem>>
      %c0_11 = arith.constant 0 : index
      %c111 = arith.constant 111 : index
      %16 = vector.load %arg6[%c0_11, %c111] : memref<2x401xf32, #tpu.memory_space<vmem>>, vector<2x256xf32>
      %17 = vector.broadcast %14 : f32 to vector<2x256xf32>
      %18 = arith.mulf %17, %16 : vector<2x256xf32>
      %19 = arith.addf %13, %18 : vector<2x256xf32>
      %c0_12 = arith.constant 0 : index
      %c111_13 = arith.constant 111 : index
      %20 = vector.load %arg7[%c0_12, %c111_13] : memref<2x401xf32, #tpu.memory_space<vmem>>, vector<2x256xf32>
      %21 = vector.broadcast %15 : f32 to vector<2x256xf32>
      %22 = arith.mulf %21, %20 : vector<2x256xf32>
      %23 = arith.addf %19, %22 : vector<2x256xf32>
      %c3 = arith.constant 3 : index
      %24 = memref.load %arg2[%c3] : memref<18xf32, #tpu.memory_space<smem>>
      %c12 = arith.constant 12 : index
      %25 = memref.load %arg2[%c12] : memref<18xf32, #tpu.memory_space<smem>>
      %c0_14 = arith.constant 0 : index
      %c127 = arith.constant 127 : index
      %26 = vector.load %arg6[%c0_14, %c127] : memref<2x401xf32, #tpu.memory_space<vmem>>, vector<2x256xf32>
      %27 = vector.broadcast %24 : f32 to vector<2x256xf32>
      %28 = arith.mulf %27, %26 : vector<2x256xf32>
      %29 = arith.addf %23, %28 : vector<2x256xf32>
      %c0_15 = arith.constant 0 : index
      %c127_16 = arith.constant 127 : index
      %30 = vector.load %arg7[%c0_15, %c127_16] : memref<2x401xf32, #tpu.memory_space<vmem>>, vector<2x256xf32>
      %31 = vector.broadcast %25 : f32 to vector<2x256xf32>
      %32 = arith.mulf %31, %30 : vector<2x256xf32>
      %33 = arith.addf %29, %32 : vector<2x256xf32>
      %c6 = arith.constant 6 : index
      %34 = memref.load %arg2[%c6] : memref<18xf32, #tpu.memory_space<smem>>
      %c15 = arith.constant 15 : index
      %35 = memref.load %arg2[%c15] : memref<18xf32, #tpu.memory_space<smem>>
      %c0_17 = arith.constant 0 : index
      %c143 = arith.constant 143 : index
      %36 = vector.load %arg6[%c0_17, %c143] : memref<2x401xf32, #tpu.memory_space<vmem>>, vector<2x256xf32>
      %37 = vector.broadcast %34 : f32 to vector<2x256xf32>
      %38 = arith.mulf %37, %36 : vector<2x256xf32>
      %39 = arith.addf %33, %38 : vector<2x256xf32>
      %c0_18 = arith.constant 0 : index
      %c143_19 = arith.constant 143 : index
      %40 = vector.load %arg7[%c0_18, %c143_19] : memref<2x401xf32, #tpu.memory_space<vmem>>, vector<2x256xf32>
      %41 = vector.broadcast %35 : f32 to vector<2x256xf32>
      %42 = arith.mulf %41, %40 : vector<2x256xf32>
      %43 = arith.addf %39, %42 : vector<2x256xf32>
      %c0_20 = arith.constant 0 : index
      %c0_21 = arith.constant 0 : index
      %44 = vector.load %arg3[%c0_20, %c0_21] : memref<3x256xf32, #tpu.memory_space<vmem>>, vector<1x256xf32>
      %45 = vector.broadcast %44 : vector<1x256xf32> to vector<2x256xf32>
      %46 = arith.mulf %43, %45 : vector<2x256xf32>
      %47 = arith.addf %12, %46 : vector<2x256xf32>
      %cst_22 = arith.constant 0.000000e+00 : f32
      %48 = vector.broadcast %cst_22 : f32 to vector<2x256xf32>
      %c1 = arith.constant 1 : index
      %49 = memref.load %arg2[%c1] : memref<18xf32, #tpu.memory_space<smem>>
      %c10 = arith.constant 10 : index
      %50 = memref.load %arg2[%c10] : memref<18xf32, #tpu.memory_space<smem>>
      %c0_23 = arith.constant 0 : index
      %c112 = arith.constant 112 : index
      %51 = vector.load %arg6[%c0_23, %c112] : memref<2x401xf32, #tpu.memory_space<vmem>>, vector<2x256xf32>
      %52 = vector.broadcast %49 : f32 to vector<2x256xf32>
      %53 = arith.mulf %52, %51 : vector<2x256xf32>
      %54 = arith.addf %48, %53 : vector<2x256xf32>
      %c0_24 = arith.constant 0 : index
      %c112_25 = arith.constant 112 : index
      %55 = vector.load %arg7[%c0_24, %c112_25] : memref<2x401xf32, #tpu.memory_space<vmem>>, vector<2x256xf32>
      %56 = vector.broadcast %50 : f32 to vector<2x256xf32>
      %57 = arith.mulf %56, %55 : vector<2x256xf32>
      %58 = arith.addf %54, %57 : vector<2x256xf32>
      %c4 = arith.constant 4 : index
      %59 = memref.load %arg2[%c4] : memref<18xf32, #tpu.memory_space<smem>>
      %c13 = arith.constant 13 : index
      %60 = memref.load %arg2[%c13] : memref<18xf32, #tpu.memory_space<smem>>
      %c0_26 = arith.constant 0 : index
      %c128 = arith.constant 128 : index
      %61 = vector.load %arg6[%c0_26, %c128] : memref<2x401xf32, #tpu.memory_space<vmem>>, vector<2x256xf32>
      %62 = vector.broadcast %59 : f32 to vector<2x256xf32>
      %63 = arith.mulf %62, %61 : vector<2x256xf32>
      %64 = arith.addf %58, %63 : vector<2x256xf32>
      %c0_27 = arith.constant 0 : index
      %c128_28 = arith.constant 128 : index
      %65 = vector.load %arg7[%c0_27, %c128_28] : memref<2x401xf32, #tpu.memory_space<vmem>>, vector<2x256xf32>
      %66 = vector.broadcast %60 : f32 to vector<2x256xf32>
      %67 = arith.mulf %66, %65 : vector<2x256xf32>
      %68 = arith.addf %64, %67 : vector<2x256xf32>
      %c7 = arith.constant 7 : index
      %69 = memref.load %arg2[%c7] : memref<18xf32, #tpu.memory_space<smem>>
      %c16 = arith.constant 16 : index
      %70 = memref.load %arg2[%c16] : memref<18xf32, #tpu.memory_space<smem>>
      %c0_29 = arith.constant 0 : index
      %c144 = arith.constant 144 : index
      %71 = vector.load %arg6[%c0_29, %c144] : memref<2x401xf32, #tpu.memory_space<vmem>>, vector<2x256xf32>
      %72 = vector.broadcast %69 : f32 to vector<2x256xf32>
      %73 = arith.mulf %72, %71 : vector<2x256xf32>
      %74 = arith.addf %68, %73 : vector<2x256xf32>
      %c0_30 = arith.constant 0 : index
      %c144_31 = arith.constant 144 : index
      %75 = vector.load %arg7[%c0_30, %c144_31] : memref<2x401xf32, #tpu.memory_space<vmem>>, vector<2x256xf32>
      %76 = vector.broadcast %70 : f32 to vector<2x256xf32>
      %77 = arith.mulf %76, %75 : vector<2x256xf32>
      %78 = arith.addf %74, %77 : vector<2x256xf32>
      %79 = arith.addf %47, %78 : vector<2x256xf32>
      %cst_32 = arith.constant 0.000000e+00 : f32
      %80 = vector.broadcast %cst_32 : f32 to vector<2x256xf32>
      %c2 = arith.constant 2 : index
      %81 = memref.load %arg2[%c2] : memref<18xf32, #tpu.memory_space<smem>>
      %c11 = arith.constant 11 : index
      %82 = memref.load %arg2[%c11] : memref<18xf32, #tpu.memory_space<smem>>
      %c0_33 = arith.constant 0 : index
      %c113 = arith.constant 113 : index
      %83 = vector.load %arg6[%c0_33, %c113] : memref<2x401xf32, #tpu.memory_space<vmem>>, vector<2x256xf32>
      %84 = vector.broadcast %81 : f32 to vector<2x256xf32>
      %85 = arith.mulf %84, %83 : vector<2x256xf32>
      %86 = arith.addf %80, %85 : vector<2x256xf32>
      %c0_34 = arith.constant 0 : index
      %c113_35 = arith.constant 113 : index
      %87 = vector.load %arg7[%c0_34, %c113_35] : memref<2x401xf32, #tpu.memory_space<vmem>>, vector<2x256xf32>
      %88 = vector.broadcast %82 : f32 to vector<2x256xf32>
      %89 = arith.mulf %88, %87 : vector<2x256xf32>
      %90 = arith.addf %86, %89 : vector<2x256xf32>
      %c5 = arith.constant 5 : index
      %91 = memref.load %arg2[%c5] : memref<18xf32, #tpu.memory_space<smem>>
      %c14 = arith.constant 14 : index
      %92 = memref.load %arg2[%c14] : memref<18xf32, #tpu.memory_space<smem>>
      %c0_36 = arith.constant 0 : index
      %c129 = arith.constant 129 : index
      %93 = vector.load %arg6[%c0_36, %c129] : memref<2x401xf32, #tpu.memory_space<vmem>>, vector<2x256xf32>
      %94 = vector.broadcast %91 : f32 to vector<2x256xf32>
      %95 = arith.mulf %94, %93 : vector<2x256xf32>
      %96 = arith.addf %90, %95 : vector<2x256xf32>
      %c0_37 = arith.constant 0 : index
      %c129_38 = arith.constant 129 : index
      %97 = vector.load %arg7[%c0_37, %c129_38] : memref<2x401xf32, #tpu.memory_space<vmem>>, vector<2x256xf32>
      %98 = vector.broadcast %92 : f32 to vector<2x256xf32>
      %99 = arith.mulf %98, %97 : vector<2x256xf32>
      %100 = arith.addf %96, %99 : vector<2x256xf32>
      %c8 = arith.constant 8 : index
      %101 = memref.load %arg2[%c8] : memref<18xf32, #tpu.memory_space<smem>>
      %c17 = arith.constant 17 : index
      %102 = memref.load %arg2[%c17] : memref<18xf32, #tpu.memory_space<smem>>
      %c0_39 = arith.constant 0 : index
      %c145 = arith.constant 145 : index
      %103 = vector.load %arg6[%c0_39, %c145] : memref<2x401xf32, #tpu.memory_space<vmem>>, vector<2x256xf32>
      %104 = vector.broadcast %101 : f32 to vector<2x256xf32>
      %105 = arith.mulf %104, %103 : vector<2x256xf32>
      %106 = arith.addf %100, %105 : vector<2x256xf32>
      %c0_40 = arith.constant 0 : index
      %c145_41 = arith.constant 145 : index
      %107 = vector.load %arg7[%c0_40, %c145_41] : memref<2x401xf32, #tpu.memory_space<vmem>>, vector<2x256xf32>
      %108 = vector.broadcast %102 : f32 to vector<2x256xf32>
      %109 = arith.mulf %108, %107 : vector<2x256xf32>
      %110 = arith.addf %106, %109 : vector<2x256xf32>
      %c2_42 = arith.constant 2 : index
      %c0_43 = arith.constant 0 : index
      %111 = vector.load %arg3[%c2_42, %c0_43] : memref<3x256xf32, #tpu.memory_space<vmem>>, vector<1x256xf32>
      %112 = vector.broadcast %111 : vector<1x256xf32> to vector<2x256xf32>
      %113 = arith.mulf %110, %112 : vector<2x256xf32>
      %114 = arith.addf %79, %113 : vector<2x256xf32>
      %115 = arith.negf %114 : vector<2x256xf32>
      %116 = math.exp %115 : vector<2x256xf32>
      %cst_44 = arith.constant 1.000000e+00 : f32
      %117 = vector.broadcast %cst_44 : f32 to vector<2x256xf32>
      %118 = arith.addf %117, %116 : vector<2x256xf32>
      %119 = arith.divf %117, %118 : vector<2x256xf32>
      %c0_45 = arith.constant 0 : index
      %c0_46 = arith.constant 0 : index
      %c0_47 = arith.constant 0 : index
      %120 = vector.load %arg5[%c0_45, %c0_46, %c0_47] : memref<2x1x256xf32, #tpu.memory_space<vmem>>, vector<2x1x256xf32>
      %121 = vector.shape_cast %120 : vector<2x1x256xf32> to vector<2x256xf32>
      %122 = vector.shape_cast %119 : vector<2x256xf32> to vector<2x1x256xf32>
      tpu.vector_store %arg5[%c0_45, %c0_46, %c0_47], %122 {strides = array<i32>} : memref<2x1x256xf32, #tpu.memory_space<vmem>>, vector<2x1x256xf32>,
    } else {
    }
    return
  }
  func.func @transform_0(%arg0: i32, %arg1: i32) -> i32 {
    %c0_i32 = arith.constant 0 : i32
    %c0_i32_0 = arith.constant 0 : i32
    return %c0_i32 : i32
  }
  func.func @transform_1(%arg0: i32, %arg1: i32) -> (i32, i32) {
    %c0_i32 = arith.constant 0 : i32
    %c0_i32_0 = arith.constant 0 : i32
    %c0_i32_1 = arith.constant 0 : i32
    return %c0_i32, %c0_i32_0 : i32, i32
  }
  func.func @transform_2(%arg0: i32, %arg1: i32) -> (i32, i32, i32) {
    %c0_i32 = arith.constant 0 : i32
    %c0_i32_0 = arith.constant 0 : i32
    return %arg0, %arg1, %c0_i32 : i32, i32, i32
  }
  func.func @transform_3(%arg0: i32, %arg1: i32) -> (i32, i32, i32) {
    %c0_i32 = arith.constant 0 : i32
    %c0_i32_0 = arith.constant 0 : i32
    %c0_i32_1 = arith.constant 0 : i32
    return %arg0, %c0_i32, %c0_i32_0 : i32, i32, i32
  }
}

</mosaic_0001>

<bundles_post_ra>
// kernel: spatial_attention.1
= control target key start
LH: loop header
LB: loop body
LE: loop exit
PB: predicated region body
PF: predicated region fallthrough
CT: control target
= control target key end

     0   :  { %8 = vsyncpa [#allocation5], 0  ;;  %s674_s0 = inlined_call_operand.vmem [shape: f32[18], index: 0, kind: input, shape index: {}]   ;;  %s675_s1 = inlined_call_operand.vmem [shape: f32[3,256], index: 1, kind: input, shape index: {}]   ;;  %s676_s2 = inlined_call_operand.vmem [shape: f32[2,4,256], index: 2, kind: input, shape index: {}]   ;;  %s677_s3 = inlined_call_operand.vmem [shape: f32[2,1,256], index: 3, kind: output, shape index: {}]  }
   0x1   :  { %s15_s14 = sshll.u32 %s674_s0, 4  ;;  %s16_s14 = int_to_ptr.vmem [resolvable:$true] %s15_s14 }
   0x2   :  { %s537_s15 = scalar_lea.vmem %s16_s14, 16  ;;  %p542_p1 = scmp.lt.s32.totalorder %s16_s14, %s16_s14 }
   0x3   :  { %p538_p0 = scmp.ne.s32.totalorder %s16_s14, %s537_s15  ;;  %p543_p2 = scmp.lt.s32.totalorder %s537_s15, %s537_s15 }
   0x5   :  { %p544_p3 = por %p543_p2, %p542_p1 }
   0x7   :  { %p545_p4 = pnand %p544_p3, %p538_p0 }
   0x9   :  { %548 = shalt.err (!%p545_p4)
}
   0xa   :  { %s551_s16 = smov [#allocation4]  }
   0xb   :  { %18 = dma.vmem_to_smem %s16_s14, 16, %s551_s16, [#allocation5]  }
   0xc   :  { %549 = dma.done.wait [#allocation5], 16  }
   0xd   :  { %550 = vsyncadd [#allocation5], 4294967280 }
   0xe   :  { %26 = sfence }
   0xf   :  { %v27_v0 = vld [vmem:[%s676_s2] sm:$0xff]  ;;  %v28_v1 = vld [vmem:[%s676_s2 + $0x8] sm:$0xff]  ;;  %vm35_vm0 = vcmask 1043456   ;;  %v552_v10 = vmov 1983009808   ;;  %v109_v12 = vlaneseq  ;;  %v553_v58 = vmov 0.0  }
  0x10   :  { %v31_v2 = vcombine.high %v27_v0, %v27_v0  ;;  %v32_v3 = vcombine.high %v28_v1, %v28_v1  ;;  %v64_v4 = vsel %vm35_vm0, %v27_v0, -inf  ;;  %v78_v5 = vsel %vm35_vm0, %v28_v1, -inf  ;;  %96 = vst [vmem:[#allocation2] sm:$0x3] %v553_v58  ;;  %99 = vst [vmem:[#allocation3] sm:$0x3] %v553_v58 }
  0x11   :  { %v65_v6 = vrot.slane %v64_v4, 4  ;;  %v79_v7 = vrot.slane %v78_v5, 4  ;;  %v107_v11 = vunpack.c.l.s4 %v552_v10  ;;  %v36_v17 = vsel %vm35_vm0, %v27_v0, 0.0  ;;  %s509_s0 = sld [smem:[#allocation4 + $0xd]]  ;;  %s515_s2 = sld [smem:[#allocation4 + $0xe]] }
  0x12   :  { %v71_v8 = vsel %vm35_vm0, %v31_v2, -inf  ;;  %v85_v9 = vsel %vm35_vm0, %v32_v3, -inf  ;;  %v43_v18 = vsel %vm35_vm0, %v31_v2, 0.0  ;;  %v598_v24 = vshrl.u32 %v109_v12, 7  ;;  %s508_s21 = sld [smem:[#allocation4 + $0x4]]  ;;  %s516_s22 = sld [smem:[#allocation4 + $0x8]] }
  0x13   :  { %v66_v13 = vmax.f32 %v64_v4, %v65_v6  ;;  %v72_v14 = vrot.slane %v71_v8, 4  ;;  %v80_v15 = vmax.f32 %v78_v5, %v79_v7  ;;  %v86_v16 = vrot.slane %v85_v9, 4  ;;  %s514_s23 = sld [smem:[#allocation4 + $0x5]]  ;;  %s517_s24 = sld [smem:[#allocation4 + $0x11]] }
  0x14   :  { %v108_v23 = vunpack.c.0.s8 %v107_v11  ;;  %v37_v25 = vrot.slane %v36_v17, 4  ;;  %v44_v26 = vrot.slane %v43_v18, 4  ;;  %v50_v33 = vsel %vm35_vm0, %v28_v1, 0.0  ;;  %s554_s25 = smov 112   ;;  %s618_s26 = sld [smem:[#allocation4 + $0x7]] }
  0x15   :  { %v67_v19 = vrot.slane %v66_v13, 2  ;;  %v73_v20 = vmax.f32 %v71_v8, %v72_v14  ;;  %v81_v21 = vrot.slane %v80_v15, 2  ;;  %v87_v22 = vmax.f32 %v85_v9, %v86_v16  ;;  %s620_s27 = sld [smem:[#allocation4 + $0x3]]  ;;  %s622_s28 = sld [smem:[#allocation4 + $0x10]] }
  0x16   :  { %v38_v31 = vadd.f32 %v37_v25, %v36_v17  ;;  %v45_v32 = vadd.f32 %v44_v26, %v43_v18  ;;  %v57_v34 = vsel %vm35_vm0, %v32_v3, 0.0  ;;  %v51_v41 = vrot.slane %v50_v33, 4  ;;  %s625_s29 = sld [smem:[#allocation4 + $0x6]]  ;;  %s240_s30 = sld [smem:[#allocation4]] }
  0x17   :  { %v68_v27 = vmax.f32 %v66_v13, %v67_v19  ;;  %v74_v28 = vrot.slane %v73_v20, 2  ;;  %v82_v29 = vmax.f32 %v80_v15, %v81_v21  ;;  %v88_v30 = vrot.slane %v87_v22, 2  ;;  %s501_s4 = sld [smem:[#allocation4 + $0x9]]  ;;  %s555_s7 = smov 96  }
  0x18   :  { %v39_v39 = vrot.slane %v38_v31, 2  ;;  %v46_v40 = vrot.slane %v45_v32, 2  ;;  %v58_v42 = vrot.slane %v57_v34, 4  ;;  %v52_v49 = vadd.f32 %v51_v41, %v50_v33  ;;  %s503_s10 = sld [smem:[#allocation4 + $0xc]]  ;;  %s556_s11 = smov 113  }
  0x19   :  { %v69_v35 = vrot.slane %v68_v27, 1  ;;  %v75_v36 = vmax.f32 %v73_v20, %v74_v28  ;;  %v83_v37 = vrot.slane %v82_v29, 1  ;;  %v89_v38 = vmax.f32 %v87_v22, %v88_v30  ;;  %s557_s12 = smov 111   ;;  %s506_s13 = sld [smem:[#allocation4 + $0x1]] }
  0x1a   :  { %v40_v47 = vadd.f32 %v39_v39, %v38_v31  ;;  %v47_v48 = vadd.f32 %v46_v40, %v45_v32  ;;  %v59_v50 = vadd.f32 %v58_v42, %v57_v34  ;;  %v603_v53 = vsub.s32 %v108_v23, %v598_v24  ;;  %v518_v40 = vld [vmem:[%s675_s1 + $0x2] ss:$4 sm:$0x3]  ;;  %s507_s14 = sld [smem:[#allocation4 + $0xa]]  ;;  %s513_s16 = sld [smem:[#allocation4 + $0xb]] }
  0x1b   :  { %v70_v43 = vmax.f32 %v68_v27, %v69_v35  ;;  %v76_v44 = vrot.slane %v75_v36, 1  ;;  %v84_v45 = vmax.f32 %v82_v29, %v83_v37  ;;  %v90_v46 = vrot.slane %v89_v38, 1  ;;  %s512_s15 = sld [smem:[#allocation4 + $0x2]]  ;;  %s558_s17 = smov 127  }
  0x1c   :  { %v41_v54 = vrot.slane %v40_v47, 1  ;;  %v48_v55 = vrot.slane %v47_v48, 1  ;;  %v53_v56 = vrot.slane %v52_v49, 2  ;;  %v60_v57 = vrot.slane %v59_v50, 2  ;;  %s559_s18 = smov 126   ;;  %s561_s19 = smov 17  }
  0x1d   :  { %v77_v51 = vmax.f32 %v75_v36, %v76_v44  ;;  %v91_v52 = vmax.f32 %v89_v38, %v90_v46  ;;  %vm97_vm1 = vcmask 132096   ;;  %vm126_vm2 = vcmask 1041409  }
  0x1e   :  { %v42_v61 = vadd.f32 %v41_v54, %v40_v47  ;;  %v49_v62 = vadd.f32 %v48_v55, %v47_v48  ;;  %v54_v63 = vadd.f32 %v53_v56, %v52_v49  ;;  %v61_v0 = vadd.f32 %v60_v57, %v59_v50  ;;  %100 = vst.msk [vmem:[#allocation3 + $0x6] sm:$0x3] %vm97_vm1, %v553_v58 }
  0x1f   :  { %v140_v59 = vcombine.low %v70_v43, %v77_v51  ;;  %v148_v60 = vcombine.low %v84_v45, %v91_v52  ;;  %98 = vst.msk [vmem:[#allocation2 + $0x6] sm:$0x3] %vm97_vm1, %v553_v58  ;;  %vm128_vm3 = vcmask 1043459   ;;  %vm130_vm4 = vcmask 1045509  }
  0x20   :  { %v55_v3 = vrot.slane %v54_v63, 1  ;;  %v62_v4 = vrot.slane %v61_v0, 1  ;;  %v105_v8 = vcombine.low %v42_v61, %v49_v62  ;;  %vm132_vm5 = vcmask 1047559   ;;  %v294_v43 = vld [vmem:[%s675_s1] ss:$4 sm:$0x3] }
  0x21   :  { %v147_v1 = vrot.slane %v140_v59, %v603_v53  ;;  %v155_v2 = vrot.slane %v148_v60, %v603_v53  ;;  %v343_v20 = vstv %s509_s0  ;;  %v401_v26 = vstv %s515_s2  ;;  %s505_s1 = sld [smem:[#allocation4 + $0xf]] }
  0x22   :  { %v56_v6 = vadd.f32 %v55_v3, %v54_v63  ;;  %v63_v7 = vadd.f32 %v62_v4, %v61_v0  ;;  %v112_v15 = vrot.slane %v105_v8, %v603_v53  ;;  %v333_v29 = vstv %s508_s21 }
  0x23   :  { %v158_v5 = vrot.slane %v155_v2, 7  ;;  %v412_v30 = vstv %s516_s22  ;;  %v392_v33 = vstv %s514_s23  ;;  %v421_v36 = vstv %s517_s24 }
  0x24   :  { %v113_v11 = vcombine.low %v56_v6, %v63_v7  ;;  %v298_v37 = vsub.s32 0, %v598_v24  ;;  %v302_v38 = vsub.s32 1, %v598_v24  ;;  %v355_v41 = vstv %s618_s26 }
  0x25   :  { %v159_v9 = vsel %vm126_vm2, %v158_v5, %v147_v1  ;;  %v252_v45 = vstv %s620_s27  ;;  %v365_v46 = vstv %s622_s28  ;;  %v243_v50 = vstv %s240_s30 }
  0x26   :  { %v160_v10 = vsel %vm128_vm3, %v158_v5, %v159_v9  ;;  %v120_v16 = vrot.slane %v113_v11, %v603_v53  ;;  %v436_v47 = vrot.slane %v518_v40, %v298_v37  ;;  %v440_v48 = vrot.slane %v518_v40, %v302_v38 }
  0x27   :  { %v161_v13 = vsel %vm130_vm4, %v158_v5, %v160_v10  ;;  %v247_v52 = vstv %s501_s4  ;;  %v299_v54 = vrot.slane %v294_v43, %v298_v37  ;;  %v303_v58 = vrot.slane %v294_v43, %v302_v38 }
  0x28   :  { %v162_v14 = vsel %vm132_vm5, %v158_v5, %v161_v13  ;;  %v125_v17 = vrot.slane %v120_v16, 7  ;;  %v274_v60 = vstv %s625_s29  ;;  %v441_v62 = vcombine.low %v436_v47, %v440_v48 }
  0x29   :  { %164 = vst [vmem:[#allocation3 + $0x2] sm:$0xf] %v162_v14  ;;  %v304_v1 = vcombine.low %v299_v54, %v303_v58  ;;  %v262_v3 = vstv %s503_s10  ;;  %v285_v7 = vstv %s505_s1  ;;  %v323_v10 = vstv %s506_s13 }
  0x2a   :  { %v127_v18 = vsel %vm126_vm2, %v125_v17, %v112_v15  ;;  %v448_v2 = vrot.slane %v441_v62, %v603_v53  ;;  %v384_v15 = vstv %s512_s15  ;;  %v387_v16 = vstv %s513_s16 }
  0x2b   :  { %v129_v19 = vsel %vm128_vm3, %v125_v17, %v127_v18  ;;  %v311_v4 = vrot.slane %v304_v1, %v603_v53  ;;  %v327_v53 = vstv %s507_s14  ;;  %vm258_vm6 = vcmask 916480  }
  0x2c   :  { %v131_v21 = vsel %vm130_vm4, %v125_v17, %v129_v19  ;;  %vm280_vm7 = vcmask 785408   ;;  %vm452_vm8 = vcmask 924672   ;;  %vm315_vm9 = vcmask 908288  }
  0x2d   :  { %v133_v22 = vsel %vm132_vm5, %v125_v17, %v131_v21  ;;  %vm378_vm10 = vcmask 1039360   ;;  %vm460_vm11 = vcmask 1031168   ;;  %vm485_vm12 = vcmask 138240  }
  0x2e   :  { %135 = vst [vmem:[#allocation2 + $0x2] sm:$0xf] %v133_v22  ;;  %vm492_vm13 = vcmp.lt.s32.totalorder %v109_v12, 256 }
  0x30   :  { %v342_v23 = vld [vmem:[#allocation3 + $0x2] sm:$0xf] }
  0x31   :  { %v364_v25 = vld [vmem:[#allocation3 + $0x2] sm:$0x3f]  ;;  %v344_v27 = vmul.f32 %v343_v20, %v342_v23 }
  0x32   :  { %v402_v28 = vmul.f32 %v401_v26, %v364_v25  ;;  %v422_v42 = vmul.f32 %v421_v36, %v364_v25  ;;  %v246_v51 = vld [vmem:[#allocation3] sm:$0x3f]  ;;  %v366_v61 = vmul.f32 %v365_v46, %v364_v25 }
  0x33   :  { %346 = vrot.lane.b32.xlu1 %v344_v27, %s554_s25  ;;  %v248_v57 = vmul.f32 %v247_v52, %v246_v51  ;;  %v263_v5 = vmul.f32 %v262_v3, %v246_v51  ;;  %v284_v6 = vld [vmem:[#allocation3 + $0x2] sm:$0x3f] }
  0x34   :  { %v286_v8 = vmul.f32 %v285_v7, %v284_v6  ;;  %v326_v11 = vld [vmem:[#allocation3] sm:$0x3f] }
  0x35   :  { %v332_v31 = vld [vmem:[#allocation2 + $0x2] sm:$0xf]  ;;  %v328_v17 = vmul.f32 %v327_v53, %v326_v11  ;;  %v388_v20 = vmul.f32 %v387_v16, %v326_v11 }
  0x36   :  { %v354_v32 = vld [vmem:[#allocation2 + $0x2] sm:$0x3f]  ;;  %v334_v34 = vmul.f32 %v333_v29, %v332_v31 }
  0x37   :  { %404 = vrot.lane.b32.xlu1 %v402_v28, %s554_s25  ;;  %v413_v35 = vmul.f32 %v412_v30, %v354_v32  ;;  %v393_v39 = vmul.f32 %v392_v33, %v354_v32  ;;  %v242_v44 = vld [vmem:[#allocation2] sm:$0x3f]  ;;  %v356_v49 = vmul.f32 %v355_v41, %v354_v32 }
  0x38   :  { %336 = vrot.lane.b32.xlu0 %v334_v34, %s554_s25  ;;  %v253_v55 = vmul.f32 %v252_v45, %v242_v44  ;;  %v244_v56 = vmul.f32 %v243_v50, %v242_v44  ;;  %v273_v59 = vld [vmem:[#allocation2 + $0x2] sm:$0x3f] }
  0x39   :  { %v275_v0 = vmul.f32 %v274_v60, %v273_v59  ;;  %v322_v13 = vld [vmem:[#allocation2] sm:$0x3f] }
  0x3a   :  { %v644_v63 = vadd.f32 %v248_v57, %v244_v56  ;;  %v324_v19 = vmul.f32 %v323_v10, %v322_v13  ;;  %v385_v21 = vmul.f32 %v384_v15, %v322_v13 }
  0x3b   :  { %415 = vrot.lane.b32.xlu1 %v413_v35, %s555_s7 }
  0x3c   :  { %395 = vrot.lane.b32.xlu0 %v393_v39, %s554_s25  ;;  %v329_v25 = vadd.f32 %v328_v17, %v324_v19  ;;  %v389_v27 = vadd.f32 %v388_v20, %v385_v21 }
  0x3f   :  { %424 = vrot.lane.b32.xlu1 %v422_v42, %s555_s7 }
  0x40   :  { %358 = vrot.lane.b32.xlu0 %v356_v49, %s555_s7 }
  0x43   :  { %255 = vrot.lane.b32.xlu1 %v253_v55, %s554_s25 }
  0x44   :  { %368 = vrot.lane.b32.xlu0 %v366_v61, %s555_s7 }
  0x47   :  { %277 = vrot.lane.b32.xlu1 %v275_v0, %s555_s7 }
  0x48   :  { %449 = vrot.lane.b32.xlu0 %v448_v2, %s556_s11 }
  0x4b   :  { %312 = vrot.lane.b32.xlu1 %v311_v4, %s557_s12 }
  0x4c   :  { %265 = vrot.lane.b32.xlu0 %v263_v5, %s554_s25 }
  0x50   :  { %288 = vrot.lane.b32.xlu0 %v286_v8, %s555_s7 }
  0xa5   :  { %v347_v9 = vpop.permute.xlu1 %346 }
  0xa6   :  { %v348_v31 = vrot.slane %v347_v9, 6 }
  0xa8   :  { %v349_v41 = vsel %vm258_vm6, %v348_v31, %v347_v9 }
  0xa9   :  { %v405_v14 = vpop.permute.xlu1 %404 }
  0xaa   :  { %v337_v18 = vpop.permute.xlu0 %336  ;;  %v406_v32 = vrot.slane %v405_v14, 6 }
  0xab   :  { %v338_v22 = vrot.slane %v337_v18, 6 }
  0xac   :  { %v407_v42 = vsel %vm258_vm6, %v406_v32, %v405_v14 }
  0xad   :  { %v416_v23 = vpop.permute.xlu1 %415  ;;  %v339_v28 = vsel %vm258_vm6, %v338_v22, %v337_v18 }
  0xae   :  { %v396_v26 = vpop.permute.xlu0 %395  ;;  %v341_v34 = vadd.f32 %v339_v28, %v329_v25  ;;  %v417_v37 = vrot.slane %v416_v23, 6 }
  0xaf   :  { %v397_v29 = vrot.slane %v396_v26, 6 }
  0xb0   :  { %v351_v46 = vadd.f32 %v349_v41, %v341_v34  ;;  %v418_v49 = vsel %vm280_vm7, %v417_v37, %v416_v23 }
  0xb1   :  { %v425_v30 = vpop.permute.xlu1 %424  ;;  %v398_v33 = vsel %vm258_vm6, %v397_v29, %v396_v26 }
  0xb2   :  { %v400_v35 = vadd.f32 %v398_v33, %v389_v27  ;;  %v359_v36 = vpop.permute.xlu0 %358  ;;  %v426_v44 = vrot.slane %v425_v30, 6  ;;  %v560_v27 = vmov 1966171168  }
  0xb3   :  { %v360_v38 = vrot.slane %v359_v36, 6  ;;  %v472_v28 = vunpack.c.l.s4 %v560_v27 }
  0xb4   :  { %v409_v45 = vadd.f32 %v407_v42, %v400_v35  ;;  %v427_v54 = vsel %vm280_vm7, %v426_v44, %v425_v30 }
  0xb5   :  { %v256_v39 = vpop.permute.xlu1 %255  ;;  %v361_v43 = vsel %vm280_vm7, %v360_v38, %v359_v36  ;;  %v473_v29 = vunpack.c.0.s8 %v472_v28 }
  0xb6   :  { %v257_v40 = vrot.slane %v256_v39, 2  ;;  %v369_v47 = vpop.permute.xlu0 %368  ;;  %v363_v52 = vadd.f32 %v361_v43, %v351_v46  ;;  %v420_v56 = vadd.f32 %v418_v49, %v409_v45 }
  0xb7   :  { %v370_v50 = vrot.slane %v369_v47, 6  ;;  %v476_v30 = vsub.s32 %v473_v29, %v598_v24 }
  0xb8   :  { %v259_v48 = vsel %vm258_vm6, %v256_v39, %v257_v40  ;;  %v429_v61 = vadd.f32 %v427_v54, %v420_v56 }
  0xb9   :  { %v261_v51 = vadd.f32 %v259_v48, %v644_v63  ;;  %v371_v55 = vsel %vm280_vm7, %v370_v50, %v369_v47  ;;  %v278_v59 = vpop.permute.xlu1 %277 }
  0xba   :  { %v373_v57 = vadd.f32 %v371_v55, %v363_v52  ;;  %v450_v58 = vpop.permute.xlu0 %449  ;;  %v279_v0 = vrot.slane %v278_v59, 6 }
  0xbb   :  { %v451_v60 = vrot.slane %v450_v58, 6 }
  0xbc   :  { %375 = vrot.lane.b32.xlu0 %v373_v57, %s558_s17  ;;  %v281_v4 = vsel %vm280_vm7, %v279_v0, %v278_v59 }
  0xbd   :  { %v453_v62 = vsel %vm452_vm8, %v451_v60, %v450_v58  ;;  %v313_v11 = vpop.permute.xlu1 %312 }
  0xbe   :  { %v455_v1 = vmul.f32 %v453_v62, %v429_v61  ;;  %v266_v2 = vpop.permute.xlu0 %265  ;;  %v314_v53 = vrot.slane %v313_v11, 6 }
  0xbf   :  { %v267_v3 = vrot.slane %v266_v2, 2 }
  0xc0   :  { %457 = vrot.lane.b32.xlu1 %v455_v1, %s559_s18  ;;  %v316_v13 = vsel %vm315_vm9, %v314_v53, %v313_v11 }
  0xc1   :  { %v268_v63 = vsel %vm258_vm6, %v266_v2, %v267_v3 }
  0xc2   :  { %v270_v5 = vadd.f32 %v268_v63, %v261_v51  ;;  %v289_v6 = vpop.permute.xlu0 %288 }
  0xc3   :  { %v290_v7 = vrot.slane %v289_v6, 6 }
  0xc4   :  { %v283_v8 = vadd.f32 %v281_v4, %v270_v5 }
  0xc5   :  { %v291_v9 = vsel %vm280_vm7, %v290_v7, %v289_v6 }
  0xc6   :  { %v293_v10 = vadd.f32 %v291_v9, %v283_v8 }
  0xc8   :  { %v318_v16 = vmul.f32 %v316_v13, %v293_v10 }
 0x12e   :  { %v376_v14 = vpop.permute.xlu0 %375 }
 0x12f   :  { %v377_v15 = vrot.slane %v376_v14, 2 }
 0x131   :  { %v379_v17 = vsel %vm378_vm10, %v376_v14, %v377_v15 }
 0x132   :  { %v458_v18 = vpop.permute.xlu1 %457  ;;  %v381_v20 = vadd.f32 %v379_v17, %v318_v16 }
 0x133   :  { %v459_v19 = vrot.slane %v458_v18, 2 }
 0x135   :  { %v461_v21 = vsel %vm460_vm11, %v458_v18, %v459_v19 }
 0x136   :  { %v463_v22 = vadd.f32 %v461_v21, %v381_v20 }
 0x138   :  { %v519_v23 = vmul.f32 -1.442695, %v463_v22 }
 0x13a   :  { %533 = vpow2.f32 %v519_v23 }
 0x144   :  { %v534_v25 = vpop.eup %533 }
 0x145   :  { %v467_v26 = vadd.f32 1.0, %v534_v25 }
 0x147   :  { %535 = vrcp.f32 %v467_v26 }
 0x151   :  { %v536_v31 = vpop.eup %535 }
 0x152   :  { %v477_v32 = vrot.slane %v536_v31, %v476_v30 }
 0x154   :  { %479 = vrot.lane.b32.xlu0 %v477_v32, %s561_s19  ;;  %v478_v33 = vcombine.high %v477_v32, %v477_v32 }
 0x156   :  { %481 = vrot.lane.b32.xlu1 %v478_v33, %s561_s19 }
 0x1c6   :  { %v480_v34 = vpop.permute.xlu0 %479 }
 0x1c7   :  { %v483_v35 = vrot.slane %v480_v34, 1 }
 0x1c8   :  { %v482_v36 = vpop.permute.xlu1 %481 }
 0x1c9   :  { %v486_v37 = vsel %vm485_vm12, %v480_v34, %v483_v35  ;;  %v484_v38 = vrot.slane %v482_v36, 1 }
 0x1ca   :  { %494 = vst.msk [vmem:[%s677_s3] sm:$0x3] %vm492_vm13, %v486_v37 }
 0x1cb   :  { %v487_v39 = vsel %vm485_vm12, %v482_v36, %v484_v38 }
 0x1cc   :  { %495 = vst.msk [vmem:[%s677_s3 + $0x2] sm:$0x3] %vm492_vm13, %v487_v39 }
 0x1cd   :  { %500 = vsyncpa [#allocation5], 1 }

</bundles_post_ra>
